<compile_context>
chip_gen: v7x
topology: tpu7x:2x2x1
jax: 0.10.0
libtpu: 0.0.40
codegen_flags: <defaults>
</compile_context>

<pallas_src>
import jax
import jax.numpy as jnp
from jax.experimental import pallas as pl
from jax.experimental.pallas import tpu as pltpu

EMBED_DIM = 128  # CosineLayer in_features, fixed by the module


def _round_up(x, m):
    return (x + m - 1) // m * m


def _baseline_plus_kernel(x_ref, wb_ref, wt_ref, out_ref, acc_ref):
    """Tiled backbone matmul + CosineLayer epilogue.

    x_ref  : [TM, TK]      flattened-input tile
    wb_ref : [TK, 128]     backbone weight K-tile
    wt_ref : [128, Cp]     pre-normalized, pre-transposed CosineLayer weight
    out_ref: [TM, Cp]      scores tile
    acc_ref: [TM, 128] f32 accumulator (persists across the K grid axis)
    """
    k = pl.program_id(1)

    @pl.when(k == 0)
    def _():
        acc_ref[...] = jnp.zeros_like(acc_ref)

    acc_ref[...] += jnp.dot(
        x_ref[...], wb_ref[...], preferred_element_type=jnp.float32
    )

    @pl.when(k == pl.num_programs(1) - 1)
    def _():
        # ---- synthetic backbone activation ----
        feat = jnp.maximum(acc_ref[...], 0.0)                     # [TM, 128]

        # ---- CosineLayer: x / (||x||_2 + 1e-4), then w-normed linear, *2 ----
        x_norm = jnp.sqrt(jnp.sum(feat * feat, axis=1, keepdims=True))  # [TM, 1]
        inv = pl.reciprocal(x_norm + 0.0001, approx=False)              # EUP slot
        feat_n = feat * inv                                             # [TM, 128]
        cos = jnp.dot(feat_n, wt_ref[...], preferred_element_type=jnp.float32)
        out_ref[...] = (2.0 * cos).astype(out_ref.dtype)                # [TM, Cp]


def baseline_plus_forward(x_nchw, wb, v, g):
    """x_nchw: [B, C, H, W] float32 -> scores [B, nclasses] float32."""
    B = x_nchw.shape[0]
    din = x_nchw.shape[1] * x_nchw.shape[2] * x_nchw.shape[3]
    nclasses = v.shape[0]

    # ---- hoisted (batch-invariant) weight-norm: w = g * v / ||v||_row ----
    w = g * v / jnp.linalg.norm(v, axis=1, keepdims=True)   # [C, 128]
    w_t = w.T                                                # [128, C]

    x_flat = x_nchw.reshape(B, din)  # same flattening as torch .view(B, -1)

    # ---- pad to vreg / MXU friendly sizes ----
    Bp = _round_up(max(B, 1), 8)                # f32 sublane multiple
    TM = 256 if Bp >= 256 else Bp               # batch tile
    Bp = _round_up(Bp, TM)
    Kp = _round_up(din, 128)
    TK = min(512, Kp)                           # K tile
    Kp = _round_up(Kp, TK)
    Cp = _round_up(nclasses, 128)               # lane-dense output

    x_p = jnp.zeros((Bp, Kp), x_flat.dtype).at[:B, :din].set(x_flat)
    wb_p = jnp.zeros((Kp, EMBED_DIM), wb.dtype).at[:din, :].set(wb)
    wt_p = jnp.zeros((EMBED_DIM, Cp), w_t.dtype).at[:, :nclasses].set(w_t)

    grid = (Bp // TM, Kp // TK)

    out_p = pl.pallas_call(
        _baseline_plus_kernel,
        out_shape=jax.ShapeDtypeStruct((Bp, Cp), jnp.float32),
        grid_spec=pltpu.PrefetchScalarGridSpec(
            num_scalar_prefetch=0,
            grid=grid,
            in_specs=[
                pl.BlockSpec((TM, TK), lambda i, k: (i, k)),
                pl.BlockSpec((TK, EMBED_DIM), lambda i, k: (k, 0)),
                pl.BlockSpec((EMBED_DIM, Cp), lambda i, k: (0, 0)),
            ],
            out_specs=pl.BlockSpec((TM, Cp), lambda i, k: (i, 0)),
            scratch_shapes=[pltpu.VMEM((TM, EMBED_DIM), jnp.float32)],
        ),
        compiler_params=pltpu.CompilerParams(
            dimension_semantics=("parallel", "arbitrary"),
        ),
    )(x_p, wb_p, wt_p)

    return out_p[:B, :nclasses]


def _reference_forward(x_nchw, wb, v, g):
    """Pure-JAX reference mirroring the PyTorch semantics."""
    B = x_nchw.shape[0]
    x_flat = x_nchw.reshape(B, -1)
    feat = jnp.maximum(x_flat @ wb, 0.0)
    x_norm = jnp.linalg.norm(feat, axis=1, keepdims=True)
    feat_n = feat / (x_norm + 0.0001)
    w = g * v / jnp.linalg.norm(v, axis=1, keepdims=True)
    return 2.0 * (feat_n @ w.T)


if __name__ == "__main__":
    key = jax.random.PRNGKey(0)
    B, C, H, W = 2, 4, 16, 16
    nclasses = 16
    din = C * H * W

    k_x, k_wb, k_v = jax.random.split(key, 3)
    x = jax.random.normal(k_x, (B, C, H, W), dtype=jnp.float32)
    # synthetic backbone weight
    wb = jax.random.normal(k_wb, (din, EMBED_DIM), dtype=jnp.float32) * 0.02
    # CosineLayer weight-norm params: v ~ Linear-ish init, g = ||v|| (WeightNorm init)
    v = jax.random.normal(k_v, (nclasses, EMBED_DIM), dtype=jnp.float32) * 0.05
    g = jnp.linalg.norm(v, axis=1, keepdims=True)

    scores = baseline_plus_forward(x, wb, v, g)
    jax.block_until_ready(scores)

    ref = _reference_forward(x, wb, v, g)
    assert scores.shape == (B, nclasses)
    assert jnp.allclose(scores, ref, atol=1e-4, rtol=1e-4), "mismatch vs reference"

    print("KERNEL_OK")
</pallas_src>

<mosaic_0001>
module attributes {stable_mosaic.version = 11 : i64} {
  func.func @_baseline_plus_kernel(%arg0: i32, %arg1: i32, %arg2: memref<8x512xf32, #tpu.memory_space<vmem>>, %arg3: memref<512x128xf32, #tpu.memory_space<vmem>>, %arg4: memref<128x128xf32, #tpu.memory_space<vmem>>, %arg5: memref<8x128xf32, #tpu.memory_space<vmem>>, %arg6: memref<8x128xf32, #tpu.memory_space<vmem>>) attributes {dimension_semantics = [#tpu.dimension_semantics<parallel>, #tpu.dimension_semantics<arbitrary>], iteration_bounds = array<i64: 1, 2>, scalar_prefetch = 0 : i64, scratch_operands = 1 : i64, tpu.core_type = #tpu.core_type<tc>, window_params = [{transform_indices = @transform_0, window_bounds = array<i64: 8, 512>}, {transform_indices = @transform_1, window_bounds = array<i64: 512, 128>}, {pipeline_mode = #tpu.pipeline_mode<synchronous>, transform_indices = @transform_2, window_bounds = array<i64: 128, 128>}, {transform_indices = @transform_3, window_bounds = array<i64: 8, 128>}]} {
    %c0_i32 = arith.constant 0 : i32
    %0 = arith.cmpi eq, %arg1, %c0_i32 : i32
    %1 = arith.extui %0 : i1 to i32
    %c0_i32_0 = arith.constant 0 : i32
    %2 = arith.cmpi ne, %1, %c0_i32_0 : i32
    scf.if %2 {
      %cst_9 = arith.constant 0.000000e+00 : f32
      %12 = vector.broadcast %cst_9 : f32 to vector<8x128xf32>
      %c0_10 = arith.constant 0 : index
      %c0_11 = arith.constant 0 : index
      %13 = vector.load %arg6[%c0_10, %c0_11] : memref<8x128xf32, #tpu.memory_space<vmem>>, vector<8x128xf32>
      tpu.vector_store %arg6[%c0_10, %c0_11], %12 {strides = array<i32>} : memref<8x128xf32, #tpu.memory_space<vmem>>, vector<8x128xf32>,
    } else {
    }
    %c0 = arith.constant 0 : index
    %c0_1 = arith.constant 0 : index
    %3 = vector.load %arg6[%c0, %c0_1] : memref<8x128xf32, #tpu.memory_space<vmem>>, vector<8x128xf32>
    %c0_2 = arith.constant 0 : index
    %c0_3 = arith.constant 0 : index
    %4 = vector.load %arg2[%c0_2, %c0_3] : memref<8x512xf32, #tpu.memory_space<vmem>>, vector<8x512xf32>
    %c0_4 = arith.constant 0 : index
    %c0_5 = arith.constant 0 : index
    %5 = vector.load %arg3[%c0_4, %c0_5] : memref<512x128xf32, #tpu.memory_space<vmem>>, vector<512x128xf32>
    %cst = arith.constant dense<0.000000e+00> : vector<8x128xf32>
    %6 = tpu.matmul %4, %5, %cst {dimension_numbers = #tpu.dot_dimension_numbers<[1], [0], [0], [1], [0, 0, 1, 1], [], []>} : vector<8x512xf32>, vector<512x128xf32>, vector<8x128xf32> -> vector<8x128xf32>
    %7 = arith.addf %3, %6 : vector<8x128xf32>
    %c0_6 = arith.constant 0 : index
    %c0_7 = arith.constant 0 : index
    %8 = vector.load %arg6[%c0_6, %c0_7] : memref<8x128xf32, #tpu.memory_space<vmem>>, vector<8x128xf32>
    tpu.vector_store %arg6[%c0_6, %c0_7], %7 {strides = array<i32>} : memref<8x128xf32, #tpu.memory_space<vmem>>, vector<8x128xf32>,
    %c1_i32 = arith.constant 1 : i32
    %9 = arith.cmpi eq, %arg1, %c1_i32 : i32
    %10 = arith.extui %9 : i1 to i32
    %c0_i32_8 = arith.constant 0 : i32
    %11 = arith.cmpi ne, %10, %c0_i32_8 : i32
    scf.if %11 {
      %c0_9 = arith.constant 0 : index
      %c0_10 = arith.constant 0 : index
      %12 = vector.load %arg6[%c0_9, %c0_10] : memref<8x128xf32, #tpu.memory_space<vmem>>, vector<8x128xf32>
      %cst_11 = arith.constant 0.000000e+00 : f32
      %13 = vector.broadcast %cst_11 : f32 to vector<8x128xf32>
      %14 = arith.maximumf %12, %13 : vector<8x128xf32>
      %15 = arith.mulf %14, %14 : vector<8x128xf32>
      %cst_12 = arith.constant dense<0.000000e+00> : vector<8xf32>
      %16 = vector.multi_reduction <add>, %15, %cst_12 [1] : vector<8x128xf32> to vector<8xf32>
      %17 = vector.shape_cast %16 : vector<8xf32> to vector<8x1xf32>
      %18 = math.sqrt %17 : vector<8x1xf32>
      %cst_13 = arith.constant 9.99999974E-5 : f32
      %19 = vector.broadcast %cst_13 : f32 to vector<8x1xf32>
      %20 = arith.addf %18, %19 : vector<8x1xf32>
      %21 = tpu.reciprocal %20 : vector<8x1xf32> -> vector<8x1xf32>
      %22 = vector.broadcast %21 : vector<8x1xf32> to vector<8x128xf32>
      %23 = arith.mulf %14, %22 : vector<8x128xf32>
      %c0_14 = arith.constant 0 : index
      %c0_15 = arith.constant 0 : index
      %24 = vector.load %arg4[%c0_14, %c0_15] : memref<128x128xf32, #tpu.memory_space<vmem>>, vector<128x128xf32>
      %cst_16 = arith.constant dense<0.000000e+00> : vector<8x128xf32>
      %25 = tpu.matmul %23, %24, %cst_16 {dimension_numbers = #tpu.dot_dimension_numbers<[1], [0], [0], [1], [0, 0, 1, 1], [], []>} : vector<8x128xf32>, vector<128x128xf32>, vector<8x128xf32> -> vector<8x128xf32>
      %cst_17 = arith.constant 2.000000e+00 : f32
      %26 = vector.broadcast %cst_17 : f32 to vector<8x128xf32>
      %27 = arith.mulf %26, %25 : vector<8x128xf32>
      %c0_18 = arith.constant 0 : index
      %c0_19 = arith.constant 0 : index
      %28 = vector.load %arg5[%c0_18, %c0_19] : memref<8x128xf32, #tpu.memory_space<vmem>>, vector<8x128xf32>
      tpu.vector_store %arg5[%c0_18, %c0_19], %27 {strides = array<i32>} : memref<8x128xf32, #tpu.memory_space<vmem>>, vector<8x128xf32>,
    } else {
    }
    return
  }
  func.func @transform_0(%arg0: i32, %arg1: i32) -> (i32, i32) {
    %c0_i32 = arith.constant 0 : i32
    return %arg0, %arg1 : i32, i32
  }
  func.func @transform_1(%arg0: i32, %arg1: i32) -> (i32, i32) {
    %c0_i32 = arith.constant 0 : i32
    %c0_i32_0 = arith.constant 0 : i32
    return %arg1, %c0_i32 : i32, i32
  }
  func.func @transform_2(%arg0: i32, %arg1: i32) -> (i32, i32) {
    %c0_i32 = arith.constant 0 : i32
    %c0_i32_0 = arith.constant 0 : i32
    %c0_i32_1 = arith.constant 0 : i32
    return %c0_i32, %c0_i32_0 : i32, i32
  }
  func.func @transform_3(%arg0: i32, %arg1: i32) -> (i32, i32) {
    %c0_i32 = arith.constant 0 : i32
    %c0_i32_0 = arith.constant 0 : i32
    return %arg0, %c0_i32 : i32, i32
  }
}

</mosaic_0001>

<bundles_post_ra>
// kernel: tpu_custom_call.1
= control target key start
LH: loop header
LB: loop body
LE: loop exit
PB: predicated region body
PF: predicated region fallthrough
CT: control target
= control target key end

     0   :  { %8 = vsyncpa [#allocation4], 0  ;;  %s1507_s0 = inlined_call_operand.hbm [shape: f32[8,1024], index: 0, kind: input, shape index: {}]   ;;  %s1508_s1 = inlined_call_operand.hbm [shape: f32[1024,128], index: 1, kind: input, shape index: {}]   ;;  %s1509_s2 = inlined_call_operand.hbm [shape: f32[128,128], index: 2, kind: input, shape index: {}]   ;;  %s1510_s3 = inlined_call_operand.hbm [shape: f32[8,128], index: 3, kind: output, shape index: {}]  }
   0x1   :  { %10 = vsyncpa [#allocation4 + $0x1], 0 }
   0x2   :  { %11 = vsyncpa [#allocation7], 0 }
   0x3   :  { %13 = vsyncpa [#allocation7 + $0x1], 0 }
   0x4   :  { %14 = vsyncpa [#allocation5], 0  ;;  %s1208_s12 = smov 0   ;;  %s1210_s13 = smov 0  }
   0x5   :  { %s1212_s14 = smov 0   ;;  %s1214_s15 = smov 0  }
   0x6   :  { %s1216_s16 = smov 0   ;;  %s1218_s17 = smov 0  }
   0x7 LB: > { %s1237_s18 = sadd.s32 4294967295, %s1176_s17   ;;  %p54_p0 = scmp.ne.s32.totalorder %s1160_s13, %s1156_s12  ;;  %s1176_s17 = sphi %s1218_s17, %s20_s17   ;;  %s1172_s16 = sphi %s1216_s16, %s1526_s16   ;;  %s1168_s15 = sphi %s1214_s15, %s1525_s15   ;;  %s1164_s14 = sphi %s1212_s14, %s1524_s14   ;;  %s1160_s13 = sphi %s1210_s13, %s1523_s13   ;;  %s1156_s12 = sphi %s1208_s12, %s1522_s12  }
   0x8   : > { %p1511_p1 = scmp.eq.s32.totalorder %s1237_s18, 0  ;;  %p681_p2 = scmp.ge.s32.totalorder %s1176_s17, 1 }
   0x9   : > { %p138_p3 = scmp.lt.s32.totalorder %s1176_s17, 3  ;;  %s1178_s21 = smov [#allocation8]  }
   0xa   : > { %p1245_p4 = por %p1511_p1, %p54_p0  ;;  %s150_s22 = sshll.u32 %s1178_s21, 4  ;;  %s151_s22 = int_to_ptr.vmem [resolvable:$true] %s150_s22 }
   0xb   : > { %p1249_p5 = pnand %p681_p2, %p138_p3  ;;  %s29_s24 = sadd.s32 1, %s1172_s16 }
   0xc   : > { %s1514_s19 = scalar_select %p1245_p4, 1, 0 }
   0xd   : > { %s1515_s20 = scalar_select %p1249_p5, 1, 0 }
   0xe   : > { %p924_p6 = pneg %p1249_p5  ;;  %s1000_s27 = scalar_lea.hbm %s1509_s2, 2048 }
   0xf   : > { %p1001_p8 = scmp.ne.s32.totalorder %s1509_s2, %s1000_s27  ;;  %p1007_p12 = scmp.lt.u32.totalorder %s1000_s27, %s1509_s2 }
  0x10   : > { %p1257_p7 = pnand %p924_p6, %p1511_p1 }
  0x12   : > { %p1002_p9 = pneg %p1257_p7 }
  0x14   : > { %p1003_p10 = pnand %p1002_p9, %p1001_p8 }
  0x16   : > { %p1004_p11 = pneg %p1003_p10 }
  0x18   : > { %p1009_p13 = pnand %p1007_p12, %p1004_p11 }
  0x1a   : > { %1012 = shalt.err (!%p1009_p13)
}
  0x1b   : > { %s1013_s5 = scalar_lea.vmem %s151_s22, 2048  ;;  %p1021_p6 = scmp.lt.s32.totalorder %s151_s22, %s151_s22 }
  0x1c   : > { %p1014_p0 = scmp.ne.s32.totalorder %s151_s22, %s1013_s5  ;;  %p1022_p1 = scmp.lt.s32.totalorder %s1013_s5, %s1013_s5 }
  0x1e   : > { %p1016_p2 = pnand %p1014_p0, %p1002_p9  ;;  %p1023_p4 = por %p1022_p1, %p1021_p6 }
  0x20   : > { %p1017_p3 = pneg %p1016_p2 }
  0x22   : > { %p1024_p5 = pnand %p1023_p4, %p1017_p3 }
  0x24   : > { %1027 = shalt.err (!%p1024_p5)
}
  0x25   : > { %s1179_s6 = smov 128   ;;  %s1180_s7 = smov 8  }
  0x26   : > { %927 = dma.hbm_to_vmem [thread:$0]  (!%p1257_p7), %s1509_s2, 2048, %s151_s22, [#allocation7], %s1179_s6, %s1179_s6, %s1180_s7  }
  0x27   : > { %p30_p1 = scmp.ge.s32.totalorder %s29_s24, 2  ;;  %s41_s10 = sadd.s32 1, %s1164_s14 }
  0x28   : > { %p48_p4 = scmp.ne.s32.totalorder %s1164_s14, %s1160_s13  ;;  %p49_p5 = scmp.eq.s32.totalorder %s1176_s17, 0 }
  0x29   : > { %s1528_s24 = smov (%p30_p1, %s29_s24), 0  ;;  %p936_p9 = scmp.lt.s32.totalorder %s1176_s17, 2 }
  0x2a   : > { %p50_p8 = por %p49_p5, %p48_p4  ;;  %s37_s11 = ssub.s32 %s1172_s16, %s1528_s24 }
  0x2b   : > { %s1291_s12 = sand.u32 1, %s1164_s14   ;;  %p39_p10 = scmp.eq.s32.totalorder %s37_s11, 0 }
  0x2c   : > { %s684_s21 = sshll.u32 %s1291_s12, 5  ;;  %s700_s23 = sshll.u32 %s1172_s16, 9 }
  0x2d   : > { %s1296_s25 = scalar_select %p39_p10, %s1164_s14, %s41_s10  }
  0x2e   : > { %s1301_s27 = scalar_lea.hbm %s1507_s0, %s700_s23  ;;  %s168_s28 = scalar_lea.vmem [#allocation3], %s684_s21 }
  0x2f   : > { %s178_s29 = sshll.u32 %s168_s28, 4  ;;  %p1303_p7 = pnand %p936_p9, %p50_p8  ;;  %s1307_s29 = int_to_ptr.vmem [resolvable:$true] %s178_s29 }
  0x30   : > { %s687_s4 = sshll.u32 %s1291_s12, 9  ;;  %s165_s5 = scalar_lea.sflag [#allocation4], %s1291_s12 }
  0x31   : > { %s1028_s8 = scalar_lea.hbm %s1301_s27, 512  ;;  %p1030_p12 = pneg %p1303_p7 }
  0x32   : > { %p1029_p11 = scmp.ne.s32.totalorder %s1301_s27, %s1028_s8  ;;  %s1033_s11 = scalar_lea.hbm %s1507_s0, 1024 }
  0x33   : > { %p1034_p2 = scmp.lt.u32.totalorder %s1301_s27, %s1507_s0  ;;  %p1035_p3 = scmp.lt.u32.totalorder %s1033_s11, %s1028_s8 }
  0x34   : > { %p1031_p13 = pnand %p1030_p12, %p1029_p11  ;;  %p1037_p1 = scmp.lt.u32.totalorder %s1028_s8, %s1301_s27 }
  0x35   : > { %p1036_p6 = por %p1035_p3, %p1034_p2 }
  0x36   : > { %p1032_p0 = pneg %p1031_p13 }
  0x37   : > { %p1038_p4 = por %p1037_p1, %p1036_p6 }
  0x39   : > { %p1039_p5 = pnand %p1038_p4, %p1032_p0 }
  0x3b   : > { %1042 = shalt.err (!%p1039_p5)
}
  0x3c   : > { %s1043_s22 = scalar_lea.vmem %s1307_s29, 512  ;;  %s1181_s26 = smov [#allocation3]  }
  0x3d   : > { %p1044_p8 = scmp.ne.s32.totalorder %s1307_s29, %s1043_s22  ;;  %s1048_s28 = sshll.u32 %s1181_s26, 4  ;;  %s1049_s28 = int_to_ptr.vmem [resolvable:$false] %s1048_s28 }
  0x3e   : > { %s1050_s9 = scalar_lea.vmem %s1049_s28, 1024  ;;  %p1051_p11 = scmp.lt.s32.totalorder %s1307_s29, %s1049_s28 }
  0x3f   : > { %p1046_p9 = pnand %p1044_p8, %p1030_p12  ;;  %p1052_p13 = scmp.lt.s32.totalorder %s1050_s9, %s1043_s22 }
  0x41   : > { %p1047_p10 = pneg %p1046_p9  ;;  %p1053_p2 = por %p1052_p13, %p1051_p11 }
  0x43   : > { %p1054_p3 = pnand %p1053_p2, %p1047_p10 }
  0x45   : > { %1057 = shalt.err (!%p1054_p3)
}
  0x46   : > { %931 = dma.hbm_to_vmem [thread:$0]  (!%p1303_p7), %s1301_s27, 512, %s1307_s29, %s165_s5  }
  0x47   : > { %s701_s8 = sshll.u32 %s1172_s16, 13  ;;  %s189_s10 = scalar_lea.vmem [#allocation6], %s687_s4 }
  0x48   : > { %s196_s11 = sshll.u32 %s189_s10, 4  ;;  %s185_s21 = sand.u32 1, %s1176_s17   ;;  %s1339_s11 = int_to_ptr.vmem [resolvable:$true] %s196_s11 }
  0x49   : > { %s1345_s26 = scalar_lea.hbm %s1508_s1, %s701_s8  ;;  %s1347_s28 = scalar_lea.sflag [#allocation7], %s185_s21 }
  0x4a   : > { %s1058_s9 = scalar_lea.hbm %s1345_s26, 8192  ;;  %s1063_s29 = scalar_lea.hbm %s1508_s1, 16384 }
  0x4b   : > { %p1059_p0 = scmp.ne.s32.totalorder %s1345_s26, %s1058_s9  ;;  %p1064_p4 = scmp.lt.u32.totalorder %s1345_s26, %s1508_s1 }
  0x4c   : > { %p1065_p5 = scmp.lt.u32.totalorder %s1063_s29, %s1058_s9  ;;  %p1067_p9 = scmp.lt.u32.totalorder %s1058_s9, %s1345_s26 }
  0x4d   : > { %p1061_p6 = pnand %p1059_p0, %p1030_p12 }
  0x4e   : > { %p1066_p8 = por %p1065_p5, %p1064_p4 }
  0x4f   : > { %p1062_p1 = pneg %p1061_p6 }
  0x50   : > { %p1068_p10 = por %p1067_p9, %p1066_p8 }
  0x52   : > { %p1069_p11 = pnand %p1068_p10, %p1062_p1 }
  0x54   : > { %1072 = shalt.err (!%p1069_p11)
}
  0x55   : > { %s1073_s8 = scalar_lea.vmem %s1339_s11, 8192  ;;  %s1182_s10 = smov [#allocation6]  }
  0x56   : > { %p1074_p13 = scmp.ne.s32.totalorder %s1339_s11, %s1073_s8  ;;  %s1078_s21 = sshll.u32 %s1182_s10, 4  ;;  %s1079_s21 = int_to_ptr.vmem [resolvable:$false] %s1078_s21 }
  0x57   : > { %s1080_s23 = scalar_lea.vmem %s1079_s21, 16384  ;;  %p1081_p0 = scmp.lt.s32.totalorder %s1339_s11, %s1079_s21 }
  0x58   : > { %p1076_p2 = pnand %p1074_p13, %p1030_p12  ;;  %p1082_p6 = scmp.lt.s32.totalorder %s1080_s23, %s1073_s8 }
  0x5a   : > { %p1077_p3 = pneg %p1076_p2  ;;  %p1083_p4 = por %p1082_p6, %p1081_p0 }
  0x5c   : > { %p1084_p5 = pnand %p1083_p4, %p1077_p3 }
  0x5e   : > { %1087 = shalt.err (!%p1084_p5)
}
  0x5f   : > { %934 = dma.hbm_to_vmem [thread:$0]  (!%p1303_p7), %s1345_s26, 8192, %s1339_s11, %s1347_s28, %s1179_s6, %s1179_s6, %s1180_s7  }
  0x60   : > { %p1518_p12 = scmp.ne.s32.totalorder %s1515_s20, 0 }
  0x61   : > { %s210_s22 = sand.u32 (!%p1518_p12), 1, %s1160_s13   ;;  %p1519_p1 = scmp.ne.s32.totalorder (!%p1518_p12), %s1514_s19, 0 }
  0x62   : > { %208 = sbr.rel (%p1518_p12) target bundleno = 801 (0x321), region = 32  ;;  %s691_s9 = sshll.u32 (!%p1518_p12), %s210_s22, 5 }
  0x63   : > { %s211_s12 = scalar_lea.sflag (!%p1518_p12), [#allocation4], %s210_s22  ;;  %s1379_s27 = scalar_lea.vmem (!%p1518_p12), [#allocation3], %s691_s9 }
  0x69   : > { %1139 = dma.done.wait (%p1519_p1), %s211_s12, 512  }
  0x6a   : > { %1141 = vsyncadd (%p1519_p1), %s211_s12, 4294966784  ;;  %s219_s30 = sand.u32 1, %s1237_s18   ;;  %s692_s29 = sshll.u32 %s210_s22, 9 }
  0x6b   : > { %s220_s6 = scalar_lea.sflag [#allocation7], %s219_s30  ;;  %s1386_s7 = scalar_lea.vmem [#allocation6], %s692_s29 }
  0x6c   : > { %1143 = dma.done.wait (%p1519_p1), %s220_s6, 8192  }
  0x6d   : > { %1145 = vsyncadd (%p1519_p1), %s220_s6, 4294959104  ;;  %p1520_p7 = scmp.eq.s32.totalorder %s1237_s18, 0 }
  0x6f   : > { %1147 = dma.done.wait (%p1520_p7), [#allocation7], 2048   ;;  %p1521_p8 = pmov %p1520_p7 }
  0x70   : > { %p694_p9 = scmp.ne.s32.totalorder %s1168_s15, 0 }
  0x71   : > { %1149 = vsyncadd (%p1521_p8), [#allocation7], 4294965248  ;;  %v1183_v0 = vmov (!%p694_p9), 0.0  }
  0x72   : > { %255 = sbr.rel (%p694_p9) target bundleno = 121 (0x79), region = 48  ;;  %256 = vst [vmem:[#allocation2] sm:$0xff] (!%p694_p9), %v1183_v0 }
  0x79 PF: > { %v278_v1 = vld [vmem:[%s1386_s7 + $0x80] sm:$0xff]  ;;  %v279_v2 = vld [vmem:[%s1386_s7 + $0x88] sm:$0xff]  ;;  %v280_v12 = vld [vmem:[%s1386_s7 + $0x90] sm:$0xff]  ;;  %p695_p10 = scmp.ne.s32.totalorder %s1168_s15, 1 }
  0x7a   : > { %v310_v3 = vld [vmem:[%s1386_s7 + $0x180] sm:$0xff]  ;;  %v824_v4 = vpack.c.bf16 %v279_v2, %v278_v1  ;;  %v311_v5 = vld [vmem:[%s1386_s7 + $0x188] sm:$0xff]  ;;  %v281_v14 = vld [vmem:[%s1386_s7 + $0x98] sm:$0xff]  ;;  %vm1185_vm0 = vmmov (!%p695_p10), 0  }
  0x7b   : > { %v262_v6 = vld [vmem:[%s1386_s7] sm:$0xff]  ;;  %v263_v7 = vld [vmem:[%s1386_s7 + $0x8] sm:$0xff]  ;;  %v856_v8 = vpack.c.bf16 %v311_v5, %v310_v3  ;;  %v312_v15 = vld [vmem:[%s1386_s7 + $0x190] sm:$0xff]  ;;  %v828_v17 = vpack.c.bf16 %v281_v14, %v280_v12 }
  0x7c   : > { %v826_v9 = vpack.c.bf16 %v263_v7, %v262_v6  ;;  %v294_v10 = vld [vmem:[%s1386_s7 + $0x100] sm:$0xff]  ;;  %v295_v11 = vld [vmem:[%s1386_s7 + $0x108] sm:$0xff]  ;;  %825 = vmatprep.subr.bf16.mxu0 %v824_v4  ;;  %v313_v16 = vld [vmem:[%s1386_s7 + $0x198] sm:$0xff] }
  0x7d   : > { %v858_v13 = vpack.c.bf16 %v295_v11, %v294_v10  ;;  %857 = vmatprep.subr.bf16.mxu1 %v856_v8  ;;  %v860_v18 = vpack.c.bf16 %v313_v16, %v312_v15  ;;  %v264_v19 = vld [vmem:[%s1386_s7 + $0x10] sm:$0xff]  ;;  %v265_v20 = vld [vmem:[%s1386_s7 + $0x18] sm:$0xff]  ;;  %v282_v24 = vld [vmem:[%s1386_s7 + $0xa0] sm:$0xff] }
  0x7e   : > { %827 = vmatpush3.bf16.msra.mxu0 %v826_v9  ;;  %v296_v21 = vld [vmem:[%s1386_s7 + $0x110] sm:$0xff]  ;;  %v830_v22 = vpack.c.bf16 %v265_v20, %v264_v19  ;;  %v297_v23 = vld [vmem:[%s1386_s7 + $0x118] sm:$0xff]  ;;  %v283_v25 = vld [vmem:[%s1386_s7 + $0xa8] sm:$0xff] }
  0x7f   : > { %859 = vmatpush3.bf16.msra.mxu1 %v858_v13  ;;  %829 = vmatprep.subr.bf16.mxu0 %v828_v17  ;;  %v862_v26 = vpack.c.bf16 %v297_v23, %v296_v21  ;;  %v832_v27 = vpack.c.bf16 %v283_v25, %v282_v24  ;;  %v314_v28 = vld [vmem:[%s1386_s7 + $0x1a0] sm:$0xff]  ;;  %v315_v29 = vld [vmem:[%s1386_s7 + $0x1a8] sm:$0xff]  ;;  %v284_v36 = vld [vmem:[%s1386_s7 + $0xb0] sm:$0xff] }
  0x80   : > { %861 = vmatprep.subr.bf16.mxu1 %v860_v18  ;;  %v266_v30 = vld [vmem:[%s1386_s7 + $0x20] sm:$0xff]  ;;  %v864_v31 = vpack.c.bf16 %v315_v29, %v314_v28  ;;  %v267_v32 = vld [vmem:[%s1386_s7 + $0x28] sm:$0xff]  ;;  %v285_v37 = vld [vmem:[%s1386_s7 + $0xb8] sm:$0xff] }
  0x81   : > { %v298_v33 = vld [vmem:[%s1386_s7 + $0x120] sm:$0xff]  ;;  %v299_v34 = vld [vmem:[%s1386_s7 + $0x128] sm:$0xff]  ;;  %v834_v35 = vpack.c.bf16 %v267_v32, %v266_v30  ;;  %v316_v38 = vld [vmem:[%s1386_s7 + $0x1b0] sm:$0xff]  ;;  %v836_v40 = vpack.c.bf16 %v285_v37, %v284_v36 }
  0x82   : > { %831 = vmatpush3.bf16.msra.mxu0 %v830_v22  ;;  %v866_v39 = vpack.c.bf16 %v299_v34, %v298_v33  ;;  %v317_v41 = vld [vmem:[%s1386_s7 + $0x1b8] sm:$0xff]  ;;  %v268_v42 = vld [vmem:[%s1386_s7 + $0x30] sm:$0xff]  ;;  %v286_v47 = vld [vmem:[%s1386_s7 + $0xc0] sm:$0xff] }
  0x83   : > { %863 = vmatpush3.bf16.msra.mxu1 %v862_v26  ;;  %833 = vmatprep.subr.bf16.mxu0 %v832_v27  ;;  %v269_v43 = vld [vmem:[%s1386_s7 + $0x38] sm:$0xff]  ;;  %v868_v44 = vpack.c.bf16 %v317_v41, %v316_v38  ;;  %v300_v45 = vld [vmem:[%s1386_s7 + $0x130] sm:$0xff]  ;;  %v287_v48 = vld [vmem:[%s1386_s7 + $0xc8] sm:$0xff] }
  0x84   : > { %865 = vmatprep.subr.bf16.mxu1 %v864_v31  ;;  %v301_v46 = vld [vmem:[%s1386_s7 + $0x138] sm:$0xff]  ;;  %v318_v49 = vld [vmem:[%s1386_s7 + $0x1c0] sm:$0xff]  ;;  %v319_v50 = vld [vmem:[%s1386_s7 + $0x1c8] sm:$0xff]  ;;  %v838_v51 = vpack.c.bf16 %v269_v43, %v268_v42  ;;  %v840_v53 = vpack.c.bf16 %v287_v48, %v286_v47  ;;  %v1184_v48 = vmov (!%p695_p10), 0.0|0.0  }
  0x85   : > { %v870_v52 = vpack.c.bf16 %v301_v46, %v300_v45  ;;  %v270_v54 = vld [vmem:[%s1386_s7 + $0x40] sm:$0xff]  ;;  %v271_v55 = vld [vmem:[%s1386_s7 + $0x48] sm:$0xff]  ;;  %v872_v57 = vpack.c.bf16 %v319_v50, %v318_v49  ;;  %v288_v59 = vld [vmem:[%s1386_s7 + $0xd0] sm:$0xff] }
  0x86   : > { %835 = vmatpush3.bf16.msra.mxu0 %v834_v35  ;;  %v302_v56 = vld [vmem:[%s1386_s7 + $0x140] sm:$0xff]  ;;  %v303_v58 = vld [vmem:[%s1386_s7 + $0x148] sm:$0xff]  ;;  %v289_v60 = vld [vmem:[%s1386_s7 + $0xd8] sm:$0xff]  ;;  %v842_v63 = vpack.c.bf16 %v271_v55, %v270_v54 }
  0x87   : > { %867 = vmatpush3.bf16.msra.mxu1 %v866_v39  ;;  %837 = vmatprep.subr.bf16.mxu0 %v836_v40  ;;  %v320_v61 = vld [vmem:[%s1386_s7 + $0x1d0] sm:$0xff]  ;;  %v321_v62 = vld [vmem:[%s1386_s7 + $0x1d8] sm:$0xff]  ;;  %v874_v0 = vpack.c.bf16 %v303_v58, %v302_v56  ;;  %v844_v1 = vpack.c.bf16 %v289_v60, %v288_v59  ;;  %v290_v7 = vld [vmem:[%s1386_s7 + $0xe0] sm:$0xff] }
  0x88   : > { %869 = vmatprep.subr.bf16.mxu1 %v868_v44  ;;  %v272_v2 = vld [vmem:[%s1386_s7 + $0x50] sm:$0xff]  ;;  %v273_v3 = vld [vmem:[%s1386_s7 + $0x58] sm:$0xff]  ;;  %v876_v5 = vpack.c.bf16 %v321_v62, %v320_v61  ;;  %v291_v8 = vld [vmem:[%s1386_s7 + $0xe8] sm:$0xff] }
  0x89   : > { %v304_v4 = vld [vmem:[%s1386_s7 + $0x150] sm:$0xff]  ;;  %v305_v6 = vld [vmem:[%s1386_s7 + $0x158] sm:$0xff]  ;;  %v322_v9 = vld [vmem:[%s1386_s7 + $0x1e0] sm:$0xff]  ;;  %v846_v11 = vpack.c.bf16 %v273_v3, %v272_v2  ;;  %v848_v15 = vpack.c.bf16 %v291_v8, %v290_v7 }
  0x8a   : > { %839 = vmatpush3.bf16.msra.mxu0 %v838_v51  ;;  %v323_v10 = vld [vmem:[%s1386_s7 + $0x1e8] sm:$0xff]  ;;  %v274_v12 = vld [vmem:[%s1386_s7 + $0x60] sm:$0xff]  ;;  %v878_v14 = vpack.c.bf16 %v305_v6, %v304_v4  ;;  %v261_v18 = vld [vmem:[%s1379_s27 + $0x18] sm:$0xff]  ;;  %v1186_v6 = vmov (!%p695_p10), 0.0  }
  0x8b   : > { %871 = vmatpush3.bf16.msra.mxu1 %v870_v52  ;;  %841 = vmatprep.subr.bf16.mxu0 %v840_v53  ;;  %v275_v13 = vld [vmem:[%s1386_s7 + $0x68] sm:$0xff]  ;;  %v306_v16 = vld [vmem:[%s1386_s7 + $0x160] sm:$0xff]  ;;  %v880_v19 = vpack.c.bf16 %v323_v10, %v322_v9  ;;  %v292_v21 = vld [vmem:[%s1386_s7 + $0xf0] sm:$0xff] }
  0x8c   : > { %873 = vmatprep.subr.bf16.mxu1 %v872_v57  ;;  %v259_v17 = vld [vmem:[%s1379_s27 + $0x8] sm:$0xff]  ;;  %v293_v22 = vld [vmem:[%s1386_s7 + $0xf8] sm:$0xff]  ;;  %v324_v23 = vld [vmem:[%s1386_s7 + $0x1f0] sm:$0xff]  ;;  %460 = vmatprep.mubr.f32.mxu1 %v261_v18  ;;  %v850_v25 = vpack.c.bf16 %v275_v13, %v274_v12 }
  0x8d   : > { %v307_v20 = vld [vmem:[%s1386_s7 + $0x168] sm:$0xff]  ;;  %390 = vmatprep.mubr.f32.mxu0 %v259_v17  ;;  %v325_v24 = vld [vmem:[%s1386_s7 + $0x1f8] sm:$0xff]  ;;  %v852_v27 = vpack.c.bf16 %v293_v22, %v292_v21  ;;  %v276_v28 = vld [vmem:[%s1386_s7 + $0x70] sm:$0xff] }
  0x8e   : > { %843 = vmatpush3.bf16.msra.mxu0 %v842_v63  ;;  %v882_v26 = vpack.c.bf16 %v307_v20, %v306_v16  ;;  %v277_v29 = vld [vmem:[%s1386_s7 + $0x78] sm:$0xff]  ;;  %v884_v30 = vpack.c.bf16 %v325_v24, %v324_v23  ;;  %v308_v31 = vld [vmem:[%s1386_s7 + $0x170] sm:$0xff]  ;;  %v258_v35 = vld [vmem:[%s1379_s27] sm:$0xff] }
  0x8f   : > { %875 = vmatpush3.bf16.msra.mxu1 %v874_v0  ;;  %845 = vmatprep.subr.bf16.mxu0 %v844_v1  ;;  %v309_v32 = vld [vmem:[%s1386_s7 + $0x178] sm:$0xff]  ;;  %v854_v33 = vpack.c.bf16 %v277_v29, %v276_v28  ;;  %v260_v36 = vld [vmem:[%s1379_s27 + $0x10] sm:$0xff]  ;;  %v487_v50 = vld [vmem:[#allocation8] sm:$0xff] (!%p695_p10) }
  0x90   : > { %877 = vmatprep.subr.bf16.mxu1 %v876_v5  ;;  %v886_v34 = vpack.c.bf16 %v309_v32, %v308_v31  ;;  %v257_v43 = vld [vmem:[#allocation2] sm:$0xff]  ;;  %v488_v51 = vld [vmem:[#allocation8 + $0x8] sm:$0xff] (!%p695_p10)  ;;  %v489_v53 = vld [vmem:[#allocation8 + $0x10] sm:$0xff] (!%p695_p10) }
  0x91   : > { %v889_v52 = vpack.c.bf16 (!%p695_p10), %v488_v51, %v487_v50  ;;  %v490_v54 = vld [vmem:[#allocation8 + $0x18] sm:$0xff] (!%p695_p10)  ;;  %v491_v56 = vld [vmem:[#allocation8 + $0x20] sm:$0xff] (!%p695_p10)  ;;  %v492_v57 = vld [vmem:[#allocation8 + $0x28] sm:$0xff] (!%p695_p10) }
  0x92   : > { %847 = vmatpush3.bf16.msra.mxu0 %v846_v11  ;;  %v892_v55 = vpack.c.bf16 (!%p695_p10), %v490_v54, %v489_v53  ;;  %v895_v58 = vpack.c.bf16 (!%p695_p10), %v492_v57, %v491_v56  ;;  %v493_v59 = vld [vmem:[#allocation8 + $0x30] sm:$0xff] (!%p695_p10)  ;;  %v494_v60 = vld [vmem:[#allocation8 + $0x38] sm:$0xff] (!%p695_p10)  ;;  %v495_v62 = vld [vmem:[#allocation8 + $0x40] sm:$0xff] (!%p695_p10) }
  0x93   : > { %879 = vmatpush3.bf16.msra.mxu1 %v878_v14  ;;  %849 = vmatprep.subr.bf16.mxu0 %v848_v15  ;;  %v898_v61 = vpack.c.bf16 (!%p695_p10), %v494_v60, %v493_v59  ;;  %v496_v63 = vld [vmem:[#allocation8 + $0x48] sm:$0xff] (!%p695_p10)  ;;  %v497_v1 = vld [vmem:[#allocation8 + $0x50] sm:$0xff] (!%p695_p10)  ;;  %v498_v2 = vld [vmem:[#allocation8 + $0x58] sm:$0xff] (!%p695_p10) }
  0x94   : > { %881 = vmatprep.subr.bf16.mxu1 %v880_v19  ;;  %v901_v0 = vpack.c.bf16 (!%p695_p10), %v496_v63, %v495_v62  ;;  %v904_v3 = vpack.c.bf16 (!%p695_p10), %v498_v2, %v497_v1  ;;  %v499_v4 = vld [vmem:[#allocation8 + $0x60] sm:$0xff] (!%p695_p10)  ;;  %v500_v5 = vld [vmem:[#allocation8 + $0x68] sm:$0xff] (!%p695_p10)  ;;  %v501_v8 = vld [vmem:[#allocation8 + $0x70] sm:$0xff] (!%p695_p10) }
  0x95   : > { %v907_v7 = vpack.c.bf16 (!%p695_p10), %v500_v5, %v499_v4  ;;  %v502_v9 = vld [vmem:[#allocation8 + $0x78] sm:$0xff] (!%p695_p10) }
  0x96   : > { %851 = vmatpush3.bf16.msra.mxu0 %v850_v25  ;;  %v910_v10 = vpack.c.bf16 (!%p695_p10), %v502_v9, %v501_v8 }
  0x97   : > { %883 = vmatpush3.bf16.msra.mxu1 %v882_v26  ;;  %853 = vmatprep.subr.bf16.mxu0 %v852_v27 }
  0x98   : > { %885 = vmatprep.subr.bf16.mxu1 %v884_v30 }
  0x9a   : > { %855 = vmatpush3.bf16.msra.mxu0 %v854_v33 }
  0x9b   : > { %887 = vmatpush3.bf16.msra.mxu1 %v886_v34  ;;  %888 = vmatprep.subr.bf16.mxu0 (!%p695_p10), %v1184_v48 }
  0x9d   : > { %391 = vmatmul.mubr.f32.vlgmr.msra.gmra.mrb[0].mxu0 %v258_v35 }
  0x9e   : > { %461 = vmatmul.mubr.f32.vlgmr.msra.gmra.mrb[0].mxu1 %v260_v36  ;;  %890 = vmatpush3.bf16.msra.mxu0 (!%p695_p10), %v889_v52 }
  0x9f   : > { %891 = vmatprep.subr.bf16.mxu0 (!%p695_p10), %v1184_v48  ;;  %821 = vmatprep.mubr.msk.f32.mxu0 (!%p695_p10), %vm1185_vm0, %v1186_v6 }
  0xa2   : > { %893 = vmatpush3.bf16.msra.mxu0 (!%p695_p10), %v892_v55 }
  0xa3   : > { %894 = vmatprep.subr.bf16.mxu0 (!%p695_p10), %v1184_v48 }
  0xa6   : > { %896 = vmatpush3.bf16.msra.mxu0 (!%p695_p10), %v895_v58 }
  0xa7   : > { %897 = vmatprep.subr.bf16.mxu0 (!%p695_p10), %v1184_v48 }
  0xaa   : > { %899 = vmatpush3.bf16.msra.mxu0 (!%p695_p10), %v898_v61 }
  0xab   : > { %900 = vmatprep.subr.bf16.mxu0 (!%p695_p10), %v1184_v48 }
  0xae   : > { %902 = vmatpush3.bf16.msra.mxu0 (!%p695_p10), %v901_v0 }
  0xaf   : > { %903 = vmatprep.subr.bf16.mxu0 (!%p695_p10), %v1184_v48 }
  0xb2   : > { %905 = vmatpush3.bf16.msra.mxu0 (!%p695_p10), %v904_v3 }
  0xb3   : > { %906 = vmatprep.subr.bf16.mxu0 (!%p695_p10), %v1184_v48 }
  0xb6   : > { %908 = vmatpush3.bf16.msra.mxu0 (!%p695_p10), %v907_v7 }
  0xb7   : > { %909 = vmatprep.subr.bf16.mxu0 (!%p695_p10), %v1184_v48 }
  0xba   : > { %911 = vmatpush3.bf16.msra.mxu0 (!%p695_p10), %v910_v10 }
 0x170   : > { %v734_v37 = vpop.f32.mrb[0].mxu0 }
 0x171   : > { %v769_v38 = vpop.f32.mrb[0].mxu1  ;;  %v735_v39 = vpop.f32.mrb[1].mxu0 }
 0x172   : > { %v736_v40 = vadd.f32 %v735_v39, %v734_v37  ;;  %v770_v41 = vpop.f32.mrb[1].mxu1 }
 0x173   : > { %v771_v42 = vadd.f32 %v770_v41, %v769_v38  ;;  %471 = sbr.rel (%p695_p10) target bundleno = 776 (0x308), region = 52 }
 0x175   : > { %v463_v44 = vadd.f32 %v771_v42, %v736_v40 }
 0x177   : > { %v466_v45 = vadd.f32 %v463_v44, %v257_v43 }
 0x179   : > { %467 = vst [vmem:[#allocation2] sm:$0xff] %v466_v45 }
 0x180   : > { %v472_v46 = vld [vmem:[#allocation2] sm:$0xff] }
 0x181   : > { %v473_v47 = vmax.f32 %v472_v46, 0.0 }
 0x183   : > { %v474_v49 = vmul.f32 %v473_v47, %v473_v47 }
 0x185   : > { %475 = vadd.xlane.f32.xlu0 %v474_v49 }
 0x212   : > { %v476_v11 = vpop.xlane.xlu0 %475 }
 0x213   : > { %996 = vrsqrt.f32 %v476_v11  ;;  %vm479_vm1 = vcmp.eq.f32.partialorder %v476_v11, inf  ;;  %v482_v14 = vand.u32 2147483648, %v476_v11  ;;  %vm481_vm2 = vcmp.eq.f32.partialorder %v476_v11, 0.0 }
 0x21d   : > { %v997_v12 = vpop.eup %996 }
 0x21e   : > { %v478_v13 = vmul.f32 %v997_v12, %v476_v11 }
 0x220   : > { %v480_v15 = vsel %vm479_vm1, %v476_v11, %v478_v13 }
 0x221   : > { %v483_v16 = vsel %vm481_vm2, %v482_v14, %v480_v15 }
 0x222   : > { %v484_v17 = vadd.f32 0.0001, %v483_v16 }
 0x224   : > { %998 = vrcp.f32 %v484_v17 }
 0x22e   : > { %v999_v18 = vpop.eup %998 }
 0x22f   : > { %v486_v19 = vmul.f32 %v999_v18, %v473_v47 }
 0x231   : > { %822 = vmatmul.mubr.f32.vlgmr.msra.gmra.mrb[0].mxu0 %v486_v19 }
 0x304   : > { %v569_v20 = vpop.f32.mrb[0].mxu0 }
 0x305   : > { %v573_v21 = vmul.f32 2.0, %v569_v20  ;;  %v823_v22 = vpop.f32.mrb[1].mxu0 }
 0x307   : > { %574 = vst [vmem:[#allocation9] sm:$0xff] %v573_v21 }
 0x308 PF: > { %p938_p11 = scmp.eq.s32.totalorder %s1237_s18, 1  ;;  %s1187_s15 = smov [#allocation9]  }
 0x309   : > { %s584_s19 = sshll.u32 %s1187_s15, 4  ;;  %s585_s19 = int_to_ptr.vmem [resolvable:$true] %s584_s19 }
 0x30a   : > { %s1088_s20 = scalar_lea.vmem %s585_s19, 128  ;;  %p1095_p0 = scmp.lt.s32.totalorder %s585_s19, %s585_s19 }
 0x30b   : > { %p1089_p13 = scmp.ne.s32.totalorder %s585_s19, %s1088_s20  ;;  %p1096_p6 = scmp.lt.s32.totalorder %s1088_s20, %s1088_s20 }
 0x30d   : > { %p1090_p2 = pnand %p1089_p13, %p938_p11  ;;  %p1097_p4 = por %p1096_p6, %p1095_p0 }
 0x30f   : > { %p1091_p3 = pneg %p1090_p2 }
 0x311   : > { %p1098_p5 = pnand %p1097_p4, %p1091_p3 }
 0x313   : > { %1101 = shalt.err (!%p1098_p5)
}
 0x314   : > { %s1102_s28 = scalar_lea.hbm %s1510_s3, 128 }
 0x315   : > { %p1103_p12 = scmp.ne.s32.totalorder %s1510_s3, %s1102_s28  ;;  %p1108_p8 = scmp.lt.u32.totalorder %s1102_s28, %s1510_s3 }
 0x317   : > { %p1104_p1 = pnand %p1103_p12, %p938_p11 }
 0x319   : > { %p1105_p7 = pneg %p1104_p1 }
 0x31b   : > { %p1110_p9 = pnand %p1108_p8, %p1105_p7 }
 0x31d   : > { %1113 = shalt.err (!%p1110_p9)
}
 0x31e   : > { %921 = dma.vmem_to_hbm [thread:$0]  (%p938_p11), %s585_s19, 128, %s1510_s3, [#allocation5]  }
 0x31f   : > { %1151 = dma.done.wait (%p938_p11), [#allocation5], 128  }
 0x320   : > { %1153 = vsyncadd (%p938_p11), [#allocation5], 4294967168 }
 0x321 PF: > { %s20_s17 = sadd.s32 1, %s1176_s17   ;;  %s1522_s12 = smov %s1160_s13 }
 0x322   : > { %p17_p10 = scmp.ge.s32.totalorder %s20_s17, 4   ;;  %s1523_s13 = smov %s1164_s14 }
 0x323   : > { %s1524_s14 = smov %s1296_s25  ;;  %s1525_s15 = smov %s1172_s16 }
 0x324   : > { %s1526_s16 = smov %s1528_s24  ;;  %19 = sbr.rel (!%p17_p10) target bundleno = 7 (0x7), region = 95 }
 0x32b   :  { %597 = vsyncpa [#allocation4], 1 }
 0x32c   :  { %599 = vsyncpa [#allocation4 + $0x1], 1 }
 0x32d   :  { %600 = vsyncpa [#allocation7], 1 }
 0x32e   :  { %602 = vsyncpa [#allocation7 + $0x1], 1 }
 0x32f   :  { %603 = vsyncpa [#allocation5], 1 }
 0x330   :  { %605 = vsyncpa [#allocation5 + $0x1], 1 }

</bundles_post_ra>
